<compile_context>
chip_gen: v7x
topology: tpu7x:2x2x1
jax: 0.10.0
libtpu: 0.0.40
codegen_flags: <defaults>
</compile_context>

<pallas_src>
import functools

import jax
import jax.numpy as jnp
import numpy as np
from jax import lax
from jax.experimental import pallas as pl
from jax.experimental.pallas import tpu as pltpu


# ----------------------------------------------------------------------------
# The single fused Pallas kernel (one grid step == one image)
# ----------------------------------------------------------------------------

def _fused_nn_kernel(x_ref, w1_ref, b1_ref, w2_ref, b2_ref, w3_ref, b3_ref,
                     o_ref, *, H, W, Cin, C1, C2):
    f32 = jnp.float32
    dot = functools.partial(jnp.dot, preferred_element_type=f32)
    H2 = H // 2

    x = x_ref[...]                                          # (H, W*Cin)

    # --- Conv1 (3x3, pad 1) + bias + ReLU: one K=3*W*Cin matmul --------------
    zx = jnp.zeros((1, W * Cin), f32)
    x_up = jnp.concatenate([zx, x[:-1, :]], axis=0)         # x[h-1] (zero pad)
    x_dn = jnp.concatenate([x[1:, :], zx], axis=0)          # x[h+1] (zero pad)
    s1 = jnp.concatenate([x_up, x, x_dn], axis=1)           # (H, 3*W*Cin)
    y1 = jnp.maximum(dot(s1, w1_ref[...].astype(f32)) + b1_ref[...], 0.0)  # (H, W*C1)

    # --- MaxPool 2x2 stride 2 ------------------------------------------------
    # Row pair-max via a shifted concat; compact even rows with one tiny
    # in-kernel iota-generated 0/1 selector matmul.  Column (w) pair-max via a
    # lane-shifted concat; the even-column compaction is folded into the
    # packed conv2 weight (its rows for odd-w lanes are zero).
    zy = jnp.zeros((1, W * C1), f32)
    y1m = jnp.maximum(y1, jnp.concatenate([y1[1:, :], zy], axis=0))  # rows 2*h2 valid
    r_o = lax.broadcasted_iota(jnp.int32, (H2, H), 0)
    r_i = lax.broadcasted_iota(jnp.int32, (H2, H), 1)
    sel_even_rows = (r_i == 2 * r_o).astype(f32)            # (H2, H)
    hp = dot(sel_even_rows, y1m)                            # (H2, W*C1)
    zc = jnp.zeros((H2, C1), f32)
    pool = jnp.maximum(hp, jnp.concatenate([hp[:, C1:], zc], axis=1))
    # `pool` holds the true 2x2-pooled value at lanes 2*w2*C1 + c; odd-w lanes
    # are don't-care (ignored by the folded conv2 weight).

    # --- Conv2 (3x3, pad 1) + bias + ReLU: one K=3*W*C1 matmul ---------------
    zp = jnp.zeros((1, W * C1), f32)
    p_up = jnp.concatenate([zp, pool[:-1, :]], axis=0)      # pool[h2-1]
    p_dn = jnp.concatenate([pool[1:, :], zp], axis=0)       # pool[h2+1]
    s2 = jnp.concatenate([p_up, pool, p_dn], axis=1)        # (H2, 3*W*C1)
    y2 = jnp.maximum(dot(s2, w2_ref[...].astype(f32)) + b2_ref[...], 0.0)  # (H2, W2*C2)

    # --- GlobalAveragePool + Gemm + Sigmoid ----------------------------------
    # Sublane (h2) sum here; the lane (w2) sum and the 1/(H2*W2) mean scale are
    # folded into the packed Gemm weight.
    rs = jnp.sum(y2, axis=0, keepdims=True)                 # (1, W2*C2)
    logits = dot(rs, w3_ref[...]) + b3_ref[...]             # (1, Cout)
    e = jnp.exp(-jnp.abs(logits))                           # stable sigmoid
    o_ref[...] = jnp.where(logits >= 0.0, 1.0 / (1.0 + e), e / (1.0 + e))


# ----------------------------------------------------------------------------
# Host-side (one-time) packing of weights (numpy, outside jit)
# ----------------------------------------------------------------------------

def pack_params(params, *, H, W):
    w1 = np.asarray(params["w1"], np.float32)        # (3,3,Cin,C1)  HWIO
    b1 = np.asarray(params["b1"], np.float32)
    w2 = np.asarray(params["w2"], np.float32)        # (3,3,C1,C2)
    b2 = np.asarray(params["b2"], np.float32)
    w3 = np.asarray(params["w3"], np.float32)        # (C2,Cout)
    b3 = np.asarray(params["b3"], np.float32)

    assert w1.shape[:2] == (3, 3) and w2.shape[:2] == (3, 3), "3x3 convs only"
    assert H % 2 == 0 and W % 2 == 0, "2x2 max-pool requires even H, W"

    Cin, C1 = w1.shape[2], w1.shape[3]
    C2 = w2.shape[3]
    assert w2.shape[2] == C1 and w3.shape[0] == C2
    Cout = w3.shape[1]
    H2, W2 = H // 2, W // 2

    # Conv1: banded, lane-packed weight; kh taps stacked along K.
    #   (3*W*Cin, W*C1);  rows handle (kh, source-w, ci), cols (output-w, co).
    w1p = np.zeros((3, W * Cin, W * C1), np.float32)
    for kh in range(3):
        for kw in range(3):
            for wo in range(W):
                ws = wo + kw - 1
                if 0 <= ws < W:
                    w1p[kh, ws * Cin:(ws + 1) * Cin,
                        wo * C1:(wo + 1) * C1] += w1[kh, kw]
    w1_packed = w1p.reshape(3 * W * Cin, W * C1)
    b1_row = np.tile(b1, W).reshape(1, W * C1)

    # Conv2: same structure at the pooled resolution, with the even-column
    # (w) compaction of the max-pool folded in: only lanes 2*ws*C1 + c of the
    # pooled slab are read; rows for odd-w lanes stay zero.
    w2p = np.zeros((3, W * C1, W2 * C2), np.float32)
    for kh in range(3):
        for kw in range(3):
            for wo in range(W2):
                ws = wo + kw - 1
                if 0 <= ws < W2:
                    w2p[kh, (2 * ws) * C1:(2 * ws) * C1 + C1,
                        wo * C2:(wo + 1) * C2] += w2[kh, kw]
    w2_packed = w2p.reshape(3 * W * C1, W2 * C2)
    b2_row = np.tile(b2, W2).reshape(1, W2 * C2)

    # Gemm weight with the GAP lane-sum and 1/(H2*W2) mean scale folded in.
    w3p = np.zeros((W2 * C2, Cout), np.float32)
    for wo in range(W2):
        w3p[wo * C2:(wo + 1) * C2, :] = w3 / float(H2 * W2)
    b3_row = b3.reshape(1, Cout)

    return dict(
        w1p=jnp.asarray(w1_packed, jnp.bfloat16),   # bf16 halves HBM/VMEM
        b1r=jnp.asarray(b1_row, jnp.float32),
        w2p=jnp.asarray(w2_packed, jnp.bfloat16),
        b2r=jnp.asarray(b2_row, jnp.float32),
        w3p=jnp.asarray(w3p, jnp.float32),
        b3r=jnp.asarray(b3_row, jnp.float32),
    )


# ----------------------------------------------------------------------------
# Forward wrapper: one pallas_call, grid=(N,) "parallel" (one image per step)
# ----------------------------------------------------------------------------

def nn_forward(x_nchw, packed):
    """Pallas-backed forward pass of the synthetic ONNX graph (single kernel)."""
    N, Cin, H, W = x_nchw.shape
    H2, W2 = H // 2, W // 2
    C1 = packed["w1p"].shape[1] // W
    C2 = packed["w2p"].shape[1] // W2
    Cout = packed["w3p"].shape[1]

    # Layout plumbing only (tiny): NCHW -> (N, H, W*Cin), channels on lanes.
    x3 = jnp.transpose(x_nchw, (0, 2, 3, 1)).astype(jnp.float32)
    x3 = x3.reshape(N, H, W * Cin)

    kernel = functools.partial(_fused_nn_kernel,
                               H=H, W=W, Cin=Cin, C1=C1, C2=C2)

    out = pl.pallas_call(
        kernel,
        out_shape=jax.ShapeDtypeStruct((N, 1, Cout), jnp.float32),
        grid=(N,),
        in_specs=[
            pl.BlockSpec((None, H, W * Cin), lambda n: (n, 0, 0)),   # x (per image)
            pl.BlockSpec(packed["w1p"].shape, lambda n: (0, 0)),
            pl.BlockSpec(packed["b1r"].shape, lambda n: (0, 0)),
            pl.BlockSpec(packed["w2p"].shape, lambda n: (0, 0)),
            pl.BlockSpec(packed["b2r"].shape, lambda n: (0, 0)),
            pl.BlockSpec(packed["w3p"].shape, lambda n: (0, 0)),
            pl.BlockSpec(packed["b3r"].shape, lambda n: (0, 0)),
        ],
        out_specs=pl.BlockSpec((None, 1, Cout), lambda n: (n, 0, 0)),
        compiler_params=pltpu.CompilerParams(
            dimension_semantics=("parallel",)),
    )(x3, packed["w1p"], packed["b1r"], packed["w2p"], packed["b2r"],
      packed["w3p"], packed["b3r"])

    return out.reshape(N, Cout)


# ----------------------------------------------------------------------------
# Pure-JAX reference (independent ops) for a correctness sanity check
# ----------------------------------------------------------------------------

def nn_reference(x_nchw, params):
    x = jnp.transpose(x_nchw, (0, 2, 3, 1)).astype(jnp.float32)
    dn = ("NHWC", "HWIO", "NHWC")
    y = lax.conv_general_dilated(x, params["w1"], (1, 1), "SAME",
                                 dimension_numbers=dn) + params["b1"]
    y = jnp.maximum(y, 0.0)
    y = lax.reduce_window(y, -jnp.inf, lax.max,
                          (1, 2, 2, 1), (1, 2, 2, 1), "VALID")
    y = lax.conv_general_dilated(y, params["w2"], (1, 1), "SAME",
                                 dimension_numbers=dn) + params["b2"]
    y = jnp.maximum(y, 0.0)
    y = jnp.mean(y, axis=(1, 2))
    return jax.nn.sigmoid(y @ params["w3"] + params["b3"])


# ----------------------------------------------------------------------------

if __name__ == "__main__":
    N, Cin, H, W = 2, 4, 16, 16
    C1, C2, Cout = 8, 8, 4

    key = jax.random.PRNGKey(0)
    k_x, k_w1, k_b1, k_w2, k_b2, k_w3, k_b3 = jax.random.split(key, 7)

    x = jax.random.normal(k_x, (N, Cin, H, W), dtype=jnp.float32)  # NCHW input

    params = {
        "w1": 0.1 * jax.random.normal(k_w1, (3, 3, Cin, C1), dtype=jnp.float32),
        "b1": 0.1 * jax.random.normal(k_b1, (C1,), dtype=jnp.float32),
        "w2": 0.1 * jax.random.normal(k_w2, (3, 3, C1, C2), dtype=jnp.float32),
        "b2": 0.1 * jax.random.normal(k_b2, (C2,), dtype=jnp.float32),
        "w3": 0.1 * jax.random.normal(k_w3, (C2, Cout), dtype=jnp.float32),
        "b3": 0.1 * jax.random.normal(k_b3, (Cout,), dtype=jnp.float32),
    }

    packed = pack_params(params, H=H, W=W)   # one-time host-side packing

    out = jax.jit(nn_forward)(x, packed)
    out = jax.block_until_ready(out)

    ref = jax.block_until_ready(nn_reference(x, params))
    assert out.shape == (N, Cout), out.shape
    # bf16 weight packing (f32 activations / accumulation) -> slightly looser tol.
    np.testing.assert_allclose(np.asarray(out), np.asarray(ref),
                               atol=5e-3, rtol=5e-3)

    print("KERNEL_OK")
</pallas_src>

<mosaic_0001>
module attributes {stable_mosaic.version = 11 : i64} {
  func.func @_fused_nn_kernel(%arg0: i32, %arg1: memref<1x16x64xf32, #tpu.memory_space<vmem>>, %arg2: memref<192x128xbf16, #tpu.memory_space<vmem>>, %arg3: memref<1x128xf32, #tpu.memory_space<vmem>>, %arg4: memref<384x64xbf16, #tpu.memory_space<vmem>>, %arg5: memref<1x64xf32, #tpu.memory_space<vmem>>, %arg6: memref<64x4xf32, #tpu.memory_space<vmem>>, %arg7: memref<1x4xf32, #tpu.memory_space<vmem>>, %arg8: memref<1x1x4xf32, #tpu.memory_space<vmem>>) attributes {dimension_semantics = [#tpu.dimension_semantics<parallel>], iteration_bounds = array<i64: 2>, scalar_prefetch = 0 : i64, scratch_operands = 0 : i64, tpu.core_type = #tpu.core_type<tc>, window_params = [{transform_indices = @transform_0, window_bounds = array<i64: 1, 16, 64>}, {pipeline_mode = #tpu.pipeline_mode<synchronous>, transform_indices = @transform_1, window_bounds = array<i64: 192, 128>}, {pipeline_mode = #tpu.pipeline_mode<synchronous>, transform_indices = @transform_2, window_bounds = array<i64: 1, 128>}, {pipeline_mode = #tpu.pipeline_mode<synchronous>, transform_indices = @transform_3, window_bounds = array<i64: 384, 64>}, {pipeline_mode = #tpu.pipeline_mode<synchronous>, transform_indices = @transform_4, window_bounds = array<i64: 1, 64>}, {pipeline_mode = #tpu.pipeline_mode<synchronous>, transform_indices = @transform_5, window_bounds = array<i64: 64, 4>}, {pipeline_mode = #tpu.pipeline_mode<synchronous>, transform_indices = @transform_6, window_bounds = array<i64: 1, 4>}, {transform_indices = @transform_7, window_bounds = array<i64: 1, 1, 4>}]} {
    %c0 = arith.constant 0 : index
    %c0_0 = arith.constant 0 : index
    %c0_1 = arith.constant 0 : index
    %0 = vector.load %arg1[%c0, %c0_0, %c0_1] : memref<1x16x64xf32, #tpu.memory_space<vmem>>, vector<1x16x64xf32>
    %1 = vector.shape_cast %0 : vector<1x16x64xf32> to vector<16x64xf32>
    %cst = arith.constant 0.000000e+00 : f32
    %2 = vector.broadcast %cst : f32 to vector<1x64xf32>
    %3 = vector.extract_strided_slice %1 {offsets = [0, 0], sizes = [15, 64], strides = [1, 1]} : vector<16x64xf32> to vector<15x64xf32>
    %4 = tpu.concatenate %2, %3 in 0 : vector<1x64xf32>, vector<15x64xf32> -> vector<16x64xf32>
    %5 = vector.extract_strided_slice %1 {offsets = [1, 0], sizes = [15, 64], strides = [1, 1]} : vector<16x64xf32> to vector<15x64xf32>
    %6 = tpu.concatenate %5, %2 in 0 : vector<15x64xf32>, vector<1x64xf32> -> vector<16x64xf32>
    %7 = tpu.concatenate %4, %1, %6 in 1 : vector<16x64xf32>, vector<16x64xf32>, vector<16x64xf32> -> vector<16x192xf32>
    %c0_2 = arith.constant 0 : index
    %c0_3 = arith.constant 0 : index
    %8 = vector.load %arg2[%c0_2, %c0_3] : memref<192x128xbf16, #tpu.memory_space<vmem>>, vector<192x128xbf16>
    %9 = arith.extf %8 : vector<192x128xbf16> to vector<192x128xf32>
    %cst_4 = arith.constant dense<0.000000e+00> : vector<16x128xf32>
    %10 = tpu.matmul %7, %9, %cst_4 {dimension_numbers = #tpu.dot_dimension_numbers<[1], [0], [0], [1], [0, 0, 1, 1], [], []>} : vector<16x192xf32>, vector<192x128xf32>, vector<16x128xf32> -> vector<16x128xf32>
    %c0_5 = arith.constant 0 : index
    %c0_6 = arith.constant 0 : index
    %11 = vector.load %arg3[%c0_5, %c0_6] : memref<1x128xf32, #tpu.memory_space<vmem>>, vector<1x128xf32>
    %12 = vector.broadcast %11 : vector<1x128xf32> to vector<16x128xf32>
    %13 = arith.addf %10, %12 : vector<16x128xf32>
    %cst_7 = arith.constant 0.000000e+00 : f32
    %14 = vector.broadcast %cst_7 : f32 to vector<16x128xf32>
    %15 = arith.maximumf %13, %14 : vector<16x128xf32>
    %cst_8 = arith.constant 0.000000e+00 : f32
    %16 = vector.broadcast %cst_8 : f32 to vector<1x128xf32>
    %17 = vector.extract_strided_slice %15 {offsets = [1, 0], sizes = [15, 128], strides = [1, 1]} : vector<16x128xf32> to vector<15x128xf32>
    %18 = tpu.concatenate %17, %16 in 0 : vector<15x128xf32>, vector<1x128xf32> -> vector<16x128xf32>
    %19 = arith.maximumf %15, %18 : vector<16x128xf32>
    %20 = tpu.iota {dimensions = array<i32: 0>} : vector<8x16xi32>
    %21 = tpu.iota {dimensions = array<i32: 1>} : vector<8x16xi32>
    %c2_i32 = arith.constant 2 : i32
    %22 = vector.broadcast %c2_i32 : i32 to vector<8x16xi32>
    %23 = arith.muli %22, %20 : vector<8x16xi32>
    %24 = arith.cmpi eq, %21, %23 : vector<8x16xi32>
    %25 = arith.extui %24 : vector<8x16xi1> to vector<8x16xi32>
    %26 = arith.sitofp %25 : vector<8x16xi32> to vector<8x16xf32>
    %cst_9 = arith.constant dense<0.000000e+00> : vector<8x128xf32>
    %27 = tpu.matmul %26, %19, %cst_9 {dimension_numbers = #tpu.dot_dimension_numbers<[1], [0], [0], [1], [0, 0, 1, 1], [], []>} : vector<8x16xf32>, vector<16x128xf32>, vector<8x128xf32> -> vector<8x128xf32>
    %cst_10 = arith.constant 0.000000e+00 : f32
    %28 = vector.broadcast %cst_10 : f32 to vector<8x8xf32>
    %29 = vector.extract_strided_slice %27 {offsets = [0, 8], sizes = [8, 120], strides = [1, 1]} : vector<8x128xf32> to vector<8x120xf32>
    %30 = tpu.concatenate %29, %28 in 1 : vector<8x120xf32>, vector<8x8xf32> -> vector<8x128xf32>
    %31 = arith.maximumf %27, %30 : vector<8x128xf32>
    %cst_11 = arith.constant 0.000000e+00 : f32
    %32 = vector.broadcast %cst_11 : f32 to vector<1x128xf32>
    %33 = vector.extract_strided_slice %31 {offsets = [0, 0], sizes = [7, 128], strides = [1, 1]} : vector<8x128xf32> to vector<7x128xf32>
    %34 = tpu.concatenate %32, %33 in 0 : vector<1x128xf32>, vector<7x128xf32> -> vector<8x128xf32>
    %35 = vector.extract_strided_slice %31 {offsets = [1, 0], sizes = [7, 128], strides = [1, 1]} : vector<8x128xf32> to vector<7x128xf32>
    %36 = tpu.concatenate %35, %32 in 0 : vector<7x128xf32>, vector<1x128xf32> -> vector<8x128xf32>
    %37 = tpu.concatenate %34, %31, %36 in 1 : vector<8x128xf32>, vector<8x128xf32>, vector<8x128xf32> -> vector<8x384xf32>
    %c0_12 = arith.constant 0 : index
    %c0_13 = arith.constant 0 : index
    %38 = vector.load %arg4[%c0_12, %c0_13] : memref<384x64xbf16, #tpu.memory_space<vmem>>, vector<384x64xbf16>
    %39 = arith.extf %38 : vector<384x64xbf16> to vector<384x64xf32>
    %cst_14 = arith.constant dense<0.000000e+00> : vector<8x64xf32>
    %40 = tpu.matmul %37, %39, %cst_14 {dimension_numbers = #tpu.dot_dimension_numbers<[1], [0], [0], [1], [0, 0, 1, 1], [], []>} : vector<8x384xf32>, vector<384x64xf32>, vector<8x64xf32> -> vector<8x64xf32>
    %c0_15 = arith.constant 0 : index
    %c0_16 = arith.constant 0 : index
    %41 = vector.load %arg5[%c0_15, %c0_16] : memref<1x64xf32, #tpu.memory_space<vmem>>, vector<1x64xf32>
    %42 = vector.broadcast %41 : vector<1x64xf32> to vector<8x64xf32>
    %43 = arith.addf %40, %42 : vector<8x64xf32>
    %cst_17 = arith.constant 0.000000e+00 : f32
    %44 = vector.broadcast %cst_17 : f32 to vector<8x64xf32>
    %45 = arith.maximumf %43, %44 : vector<8x64xf32>
    %cst_18 = arith.constant dense<0.000000e+00> : vector<64xf32>
    %46 = vector.multi_reduction <add>, %45, %cst_18 [0] : vector<8x64xf32> to vector<64xf32>
    %47 = vector.shape_cast %46 : vector<64xf32> to vector<1x64xf32>
    %c0_19 = arith.constant 0 : index
    %c0_20 = arith.constant 0 : index
    %48 = vector.load %arg6[%c0_19, %c0_20] : memref<64x4xf32, #tpu.memory_space<vmem>>, vector<64x4xf32>
    %cst_21 = arith.constant dense<0.000000e+00> : vector<1x4xf32>
    %49 = tpu.matmul %47, %48, %cst_21 {dimension_numbers = #tpu.dot_dimension_numbers<[1], [0], [0], [1], [0, 0, 1, 1], [], []>} : vector<1x64xf32>, vector<64x4xf32>, vector<1x4xf32> -> vector<1x4xf32>
    %c0_22 = arith.constant 0 : index
    %c0_23 = arith.constant 0 : index
    %50 = vector.load %arg7[%c0_22, %c0_23] : memref<1x4xf32, #tpu.memory_space<vmem>>, vector<1x4xf32>
    %51 = arith.addf %49, %50 : vector<1x4xf32>
    %52 = math.absf %51 : vector<1x4xf32>
    %cst_24 = arith.constant 0.000000e+00 : f32
    %53 = vector.broadcast %cst_24 : f32 to vector<1x4xf32>
    %54 = arith.subf %53, %52 : vector<1x4xf32>
    %55 = math.exp %54 : vector<1x4xf32>
    %cst_25 = arith.constant 0.000000e+00 : f32
    %56 = vector.broadcast %cst_25 : f32 to vector<1x4xf32>
    %57 = arith.cmpf oge, %51, %56 : vector<1x4xf32>
    %cst_26 = arith.constant 1.000000e+00 : f32
    %58 = vector.broadcast %cst_26 : f32 to vector<1x4xf32>
    %59 = arith.addf %58, %55 : vector<1x4xf32>
    %cst_27 = arith.constant 1.000000e+00 : f32
    %60 = vector.broadcast %cst_27 : f32 to vector<1x4xf32>
    %61 = arith.divf %60, %59 : vector<1x4xf32>
    %cst_28 = arith.constant 1.000000e+00 : f32
    %62 = vector.broadcast %cst_28 : f32 to vector<1x4xf32>
    %63 = arith.addf %62, %55 : vector<1x4xf32>
    %64 = arith.divf %55, %63 : vector<1x4xf32>
    %65 = arith.select %57, %61, %64 : vector<1x4xi1>, vector<1x4xf32>
    %c0_29 = arith.constant 0 : index
    %c0_30 = arith.constant 0 : index
    %c0_31 = arith.constant 0 : index
    %66 = vector.load %arg8[%c0_29, %c0_30, %c0_31] : memref<1x1x4xf32, #tpu.memory_space<vmem>>, vector<1x1x4xf32>
    %67 = vector.shape_cast %66 : vector<1x1x4xf32> to vector<1x4xf32>
    %68 = vector.shape_cast %65 : vector<1x4xf32> to vector<1x1x4xf32>
    tpu.vector_store %arg8[%c0_29, %c0_30, %c0_31], %68 {strides = array<i32>} : memref<1x1x4xf32, #tpu.memory_space<vmem>>, vector<1x1x4xf32>,
    return
  }
  func.func @transform_0(%arg0: i32) -> (i32, i32, i32) {
    %c0_i32 = arith.constant 0 : i32
    %c0_i32_0 = arith.constant 0 : i32
    %c0_i32_1 = arith.constant 0 : i32
    return %arg0, %c0_i32, %c0_i32_0 : i32, i32, i32
  }
  func.func @transform_1(%arg0: i32) -> (i32, i32) {
    %c0_i32 = arith.constant 0 : i32
    %c0_i32_0 = arith.constant 0 : i32
    %c0_i32_1 = arith.constant 0 : i32
    return %c0_i32, %c0_i32_0 : i32, i32
  }
  func.func @transform_2(%arg0: i32) -> (i32, i32) {
    %c0_i32 = arith.constant 0 : i32
    %c0_i32_0 = arith.constant 0 : i32
    %c0_i32_1 = arith.constant 0 : i32
    return %c0_i32, %c0_i32_0 : i32, i32
  }
  func.func @transform_3(%arg0: i32) -> (i32, i32) {
    %c0_i32 = arith.constant 0 : i32
    %c0_i32_0 = arith.constant 0 : i32
    %c0_i32_1 = arith.constant 0 : i32
    return %c0_i32, %c0_i32_0 : i32, i32
  }
  func.func @transform_4(%arg0: i32) -> (i32, i32) {
    %c0_i32 = arith.constant 0 : i32
    %c0_i32_0 = arith.constant 0 : i32
    %c0_i32_1 = arith.constant 0 : i32
    return %c0_i32, %c0_i32_0 : i32, i32
  }
  func.func @transform_5(%arg0: i32) -> (i32, i32) {
    %c0_i32 = arith.constant 0 : i32
    %c0_i32_0 = arith.constant 0 : i32
    %c0_i32_1 = arith.constant 0 : i32
    return %c0_i32, %c0_i32_0 : i32, i32
  }
  func.func @transform_6(%arg0: i32) -> (i32, i32) {
    %c0_i32 = arith.constant 0 : i32
    %c0_i32_0 = arith.constant 0 : i32
    %c0_i32_1 = arith.constant 0 : i32
    return %c0_i32, %c0_i32_0 : i32, i32
  }
  func.func @transform_7(%arg0: i32) -> (i32, i32, i32) {
    %c0_i32 = arith.constant 0 : i32
    %c0_i32_0 = arith.constant 0 : i32
    %c0_i32_1 = arith.constant 0 : i32
    return %arg0, %c0_i32, %c0_i32_0 : i32, i32, i32
  }
}

</mosaic_0001>

<bundles_post_ra>
// kernel: nn_forward.1
= control target key start
LH: loop header
LB: loop body
LE: loop exit
PB: predicated region body
PF: predicated region fallthrough
CT: control target
= control target key end

     0   :  { %12 = vsyncpa [#allocation3], 0  ;;  %s1833_s0 = inlined_call_operand.vmem [shape: f32[2,16,64], index: 0, kind: input, shape index: {}]   ;;  %s1834_s1 = inlined_call_operand.vmem [shape: bf16[192,128], index: 1, kind: input, shape index: {}]   ;;  %s1835_s2 = inlined_call_operand.vmem [shape: f32[1,128], index: 2, kind: input, shape index: {}]   ;;  %s1836_s3 = inlined_call_operand.vmem [shape: bf16[384,64], index: 3, kind: input, shape index: {}]   ;;  %s1837_s4 = inlined_call_operand.vmem [shape: f32[1,64], index: 4, kind: input, shape index: {}]   ;;  %s1838_s5 = inlined_call_operand.vmem [shape: f32[64,4], index: 5, kind: input, shape index: {}]   ;;  %s1839_s6 = inlined_call_operand.vmem [shape: f32[1,4], index: 6, kind: input, shape index: {}]   ;;  %s1840_s7 = inlined_call_operand.hbm [shape: f32[2,1,4], index: 7, kind: output, shape index: {}]  }
   0x1   :  { %14 = vsyncpa [#allocation3 + $0x1], 0  ;;  %s1546_s24 = smov 0   ;;  %s1548_s25 = smov 0  }
   0x2   :  { %s1550_s26 = smov 0   ;;  %s1552_s27 = smov 0  }
   0x3 LB: > { %s1567_s28 = sadd.s32 4294967295, %s1498_s27   ;;  %s958_s29 = sadd.s32 4294967294, %s1498_s27   ;;  %s1498_s27 = sphi %s1552_s27, %s1846_s27   ;;  %s1494_s26 = sphi %s1550_s26, %s1845_s26   ;;  %s1490_s25 = sphi %s1548_s25, %s1844_s25   ;;  %s1486_s24 = sphi %s1546_s24, %s1843_s24  }
   0x4   : > { %s1571_s30 = sadd.s32 1, %s1498_s27   ;;  %s179_s8 = sadd.s32 1, %s1494_s26 }
   0x5   : > { %s176_s9 = ssub.s32 %s1498_s27, %s1571_s30  ;;  %p189_p0 = scmp.ne.s32.totalorder %s1494_s26, %s1490_s25 }
   0x6   : > { %p177_p1 = scmp.eq.s32.totalorder %s176_s9, 0  ;;  %p190_p2 = scmp.eq.s32.totalorder %s1567_s28, 1 }
   0x7   : > { %p195_p3 = scmp.ne.s32.totalorder %s1490_s25, %s1486_s24  ;;  %p196_p4 = scmp.eq.s32.totalorder %s958_s29, 1 }
   0x8   : > { %s1582_s10 = scalar_select %p177_p1, %s1494_s26, %s179_s8  }
   0x9   : > { %p1584_p5 = por %p190_p2, %p189_p0  ;;  %p1588_p6 = por %p196_p4, %p195_p3 }
   0xa   : > { %p961_p7 = scmp.ge.s32.totalorder %s1498_s27, 1  ;;  %p240_p8 = scmp.lt.s32.totalorder %s1498_s27, 3 }
   0xc   : > { %p241_p9 = pnand %p961_p7, %p240_p8 }
   0xd   : > { %p271_p10 = scmp.lt.s32.totalorder (!%p241_p9), %s1567_s28, 1  ;;  %v979_v0 = vld [vmem:[%s1834_s1] sm:$0xff] (!%p241_p9)   ;;  %v1500_v1 = vmov (!%p241_p9), 0.0|0.0   ;;  %v1122_v2 = vld [vmem:[%s1834_s1 + $0x8] sm:$0xff] (!%p241_p9)   ;;  %vm287_vm0 = vcmask (!%p241_p9), 1046528   ;;  %vm299_vm1 = vcmask (!%p241_p9), 523264   ;;  %v449_v32 = vlaneseq (!%p241_p9) }
   0xe   : > { %244 = sbr.rel (%p241_p9) target bundleno = 1226 (0x4ca), region = 48  ;;  %1281 = vmatprep.subr.bf16.mxu0 (!%p241_p9), %v1500_v1  ;;  %1317 = vmatprep.subr.bf16.mxu1 (!%p241_p9), %v1500_v1  ;;  %s1501_s22 = smov (!%p241_p9), 64   ;;  %v1123_v9 = vld [vmem:[%s1834_s1 + $0x10] sm:$0xff] (!%p241_p9)   ;;  %vm280_vm2 = vcmask (!%p241_p9), 1040384   ;;  %v1124_v12 = vld [vmem:[%s1834_s1 + $0x18] sm:$0xff] (!%p241_p9)   ;;  %v1125_v13 = vld [vmem:[%s1834_s1 + $0x20] sm:$0xff] (!%p241_p9)  }
   0xf   : > { %1283 = vmatpush1.bf16.msra.mxu0 (!%p241_p9), %v979_v0  ;;  %v1126_v14 = vld [vmem:[%s1834_s1 + $0x28] sm:$0xff] (!%p241_p9)   ;;  %v1127_v15 = vld [vmem:[%s1834_s1 + $0x30] sm:$0xff] (!%p241_p9)   ;;  %v1128_v16 = vld [vmem:[%s1834_s1 + $0x38] sm:$0xff] (!%p241_p9)   ;;  %vm1502_vm3 = vmmov (!%p241_p9), 0   ;;  %v1503_v27 = vmov (!%p241_p9), 0.0   ;;  %v450_v37 = vshrl.u32 (!%p241_p9), %v449_v32, 7 }
  0x10   : > { %1284 = vmatprep.subr.bf16.mxu0 (!%p241_p9), %v1500_v1  ;;  %v1129_v17 = vld [vmem:[%s1834_s1 + $0x40] sm:$0xff] (!%p241_p9)   ;;  %v1130_v18 = vld [vmem:[%s1834_s1 + $0x48] sm:$0xff] (!%p241_p9)   ;;  %v1131_v19 = vld [vmem:[%s1834_s1 + $0x50] sm:$0xff] (!%p241_p9)   ;;  %1224 = vmatprep.mubr.msk.f32.mxu1 (!%p241_p9), %vm1502_vm3, %v1503_v27  ;;  %v452_v41 = vand.u32 (!%p241_p9), 127, %v449_v32  ;;  %vm457_vm5 = vcmask (!%p241_p9), 130048   ;;  %vm535_vm6 = vcmask (!%p241_p9), 982016  }
  0x11   : > { %v1132_v20 = vld [vmem:[%s1834_s1 + $0x58] sm:$0xff] (!%p241_p9)   ;;  %v964_v28 = vld [vmem:[%s1835_s2] ss:$0 sm:$0xff] (!%p241_p9)  ;;  %v453_v42 = vmul.u32 (!%p241_p9), 2, %v450_v37  ;;  %v1141_v51 = vld [vmem:[%s1836_s3 + $0x48] sm:$0xff] (!%p241_p9)   ;;  %s269_s16 = sand.u32 (!%p241_p9), 1, %s1490_s25  }
  0x12   : > { %v1140_v49 = vld [vmem:[%s1836_s3 + $0x40] sm:$0xff] (!%p241_p9)   ;;  %v1133_v52 = vld [vmem:[%s1836_s3 + $0x8] sm:$0xff] (!%p241_p9)   ;;  %v1142_v53 = vld [vmem:[%s1836_s3 + $0x50] sm:$0xff] (!%p241_p9)   ;;  %s974_s17 = sshll.u32 (!%p241_p9), %s1567_s28, 4  ;;  %vm888_vm8 = vcmask (!%p241_p9), 24576   ;;  %s891_s23 = scalar_lea.sflag (!%p241_p9), [#allocation3], %s269_s16 }
  0x13   : > { %1286 = vmatpush1.bf16.msra.mxu0 (!%p241_p9), %v1122_v2  ;;  %vm454_vm4 = vcmp.eq.s32.totalorder (!%p241_p9), %v452_v41, %v453_v42  ;;  %v1027_v50 = vld [vmem:[%s1836_s3] sm:$0xff] (!%p241_p9)   ;;  %v1134_v54 = vld [vmem:[%s1836_s3 + $0x10] sm:$0xff] (!%p241_p9)   ;;  %v1143_v55 = vld [vmem:[%s1836_s3 + $0x58] sm:$0xff] (!%p241_p9)   ;;  %s1505_s29 = smov (!%p241_p9), [#allocation2]  }
  0x14   : > { %1287 = vmatprep.subr.bf16.mxu0 (!%p241_p9), %v1500_v1  ;;  %v967_v48 = vsel (!%p241_p9), %vm454_vm4, 1.0, %v1503_v27  ;;  %v1135_v56 = vld [vmem:[%s1836_s3 + $0x18] sm:$0xff] (!%p241_p9)   ;;  %v1144_v57 = vld [vmem:[%s1836_s3 + $0x60] sm:$0xff] (!%p241_p9)   ;;  %v1145_v59 = vld [vmem:[%s1836_s3 + $0x68] sm:$0xff] (!%p241_p9)   ;;  %s1440_s8 = sshll.u32 (!%p241_p9), %s1505_s29, 4  ;;  %s1441_s8 = int_to_ptr.vmem [resolvable:$false] %s1440_s8 }
  0x15   : > { %s272_s15 = scalar_select %p271_p10, %s1567_s28, 1  ;;  %v1136_v58 = vld [vmem:[%s1836_s3 + $0x20] sm:$0xff]   ;;  %v1137_v60 = vld [vmem:[%s1836_s3 + $0x28] sm:$0xff]   ;;  %v1146_v61 = vld [vmem:[%s1836_s3 + $0x70] sm:$0xff]  }
  0x16   : > { %v1138_v62 = vld [vmem:[%s1836_s3 + $0x30] sm:$0xff]   ;;  %v1147_v63 = vld [vmem:[%s1836_s3 + $0x78] sm:$0xff]   ;;  %vm970_vm7 = vmneg %vm280_vm2  ;;  %s1442_s9 = scalar_lea.vmem %s1441_s8, 32 }
  0x17   : > { %s977_s18 = sshll.u32 %s272_s15, 4  ;;  %1289 = vmatpush1.bf16.msra.mxu0 %v1123_v9  ;;  %v1139_v0 = vld [vmem:[%s1836_s3 + $0x38] sm:$0xff]   ;;  %v1149_v9 = vld [vmem:[%s1836_s3 + $0x88] sm:$0xff]   ;;  %v969_v32 = vld [vmem:[%s1837_s4] ss:$0 sm:$0xff] }
  0x18   : > { %s275_s21 = scalar_lea.vmem %s1833_s0, %s977_s18  ;;  %1290 = vmatprep.subr.bf16.mxu0 %v1500_v1  ;;  %s270_s18 = scalar_lea.vmem [#allocation2], %s269_s16 }
  0x19   : > { %v276_v3 = vld [vmem:[%s275_s21] sm:$0xff]  ;;  %v277_v4 = vld [vmem:[%s275_s21 + $0x8] sm:$0xff]  ;;  %s1504_s21 = smov 120   ;;  %s903_s19 = sshll.u32 %s270_s18, 4  ;;  %s1793_s19 = int_to_ptr.vmem [resolvable:$true] %s903_s19 }
  0x1a   : > { %293 = vrot.lane.b32.xlu0 %v276_v3, %s1501_s22  ;;  %v281_v5 = vrot.slane %v276_v3, 7  ;;  %v288_v6 = vrot.slane %v276_v3, 1  ;;  %v282_v7 = vrot.slane %v277_v4, 7  ;;  %v289_v8 = vrot.slane %v277_v4, 1  ;;  %s1436_s28 = scalar_lea.vmem %s1793_s19, 16  ;;  %p1443_p0 = scmp.lt.s32.totalorder %s1793_s19, %s1441_s8 }
  0x1b   : > { %1292 = vmatpush1.bf16.msra.mxu0 %v1124_v12  ;;  %v1152_v12 = vld [vmem:[%s1836_s3 + $0xa0] sm:$0xff]   ;;  %p1437_p11 = scmp.ne.s32.totalorder %s1793_s19, %s1436_s28  ;;  %p1444_p1 = scmp.lt.s32.totalorder %s1442_s9, %s1436_s28 }
  0x1c   : > { %v290_v10 = vsel %vm287_vm0, %v288_v6, %v289_v8  ;;  %v283_v11 = vsel %vm280_vm2, %v281_v5, %v282_v7  ;;  %1293 = vmatprep.subr.bf16.mxu0 %v1500_v1  ;;  %v286_v21 = vsel %vm280_vm2, 0.0, %v281_v5  ;;  %v292_v23 = vsel %vm287_vm0, %v289_v8, 0.0  ;;  %v1148_v8 = vld [vmem:[%s1836_s3 + $0x80] sm:$0xff]  }
  0x1d   : > { %965 = vmatprep.mubr.msk.f32.mxu0 %vm299_vm1, %v290_v10  ;;  %v1150_v10 = vld [vmem:[%s1836_s3 + $0x90] sm:$0xff]   ;;  %p1438_p12 = pnand %p1437_p11, %p1584_p5  ;;  %p1445_p2 = por %p1444_p1, %p1443_p0 }
  0x1e   : > { %295 = vrot.lane.b32.xlu0 %v277_v4, %s1501_s22  ;;  %s1791_s22 = scalar_lea.hbm %s1840_s7, %s974_s17 }
  0x1f   : > { %1295 = vmatpush1.bf16.msra.mxu0 %v1125_v13  ;;  %v1153_v13 = vld [vmem:[%s1836_s3 + $0xa8] sm:$0xff]   ;;  %p1439_p13 = pneg %p1438_p12 }
  0x20   : > { %1296 = vmatprep.subr.bf16.mxu0 %v1500_v1 }
  0x21   : > { %p1446_p3 = pnand %p1445_p2, %p1439_p13 }
  0x23   : > { %1298 = vmatpush1.bf16.msra.mxu0 %v1126_v14  ;;  %v1154_v14 = vld [vmem:[%s1836_s3 + $0xb0] sm:$0xff]  }
  0x24   : > { %1299 = vmatprep.subr.bf16.mxu0 %v1500_v1 }
  0x27   : > { %1301 = vmatpush1.bf16.msra.mxu0 %v1127_v15  ;;  %v1155_v15 = vld [vmem:[%s1836_s3 + $0xb8] sm:$0xff]  }
  0x28   : > { %1302 = vmatprep.subr.bf16.mxu0 %v1500_v1 }
  0x2b   : > { %1304 = vmatpush1.bf16.msra.mxu0 %v1128_v16 }
  0x2c   : > { %1305 = vmatprep.subr.bf16.mxu0 %v1500_v1 }
  0x2f   : > { %1307 = vmatpush1.bf16.msra.mxu0 %v1129_v17  ;;  %v796_v17 = vld [vmem:[%s1838_s5] sm:$0xff] }
  0x30   : > { %1308 = vmatprep.subr.bf16.mxu0 %v1500_v1 }
  0x33   : > { %1310 = vmatpush1.bf16.msra.mxu0 %v1130_v18  ;;  %v797_v18 = vld [vmem:[%s1838_s5 + $0x8] sm:$0xff] }
  0x34   : > { %1311 = vmatprep.subr.bf16.mxu0 %v1500_v1 }
  0x37   : > { %1313 = vmatpush1.bf16.msra.mxu0 %v1131_v19  ;;  %v1377_v19 = vpack.c.bf16 %v797_v18, %v796_v17 }
  0x38   : > { %1314 = vmatprep.subr.bf16.mxu0 %v1500_v1 }
  0x3b   : > { %1316 = vmatpush1.bf16.msra.mxu0 %v1132_v20  ;;  %v798_v20 = vld [vmem:[%s1838_s5 + $0x10] sm:$0xff] }
  0x3c   : > { %1376 = vmatprep.subr.bf16.mxu0 %v1500_v1 }
  0x8c   : > { %v294_v22 = vpop.permute.xlu0 %293 }
  0x8d   : > { %v300_v24 = vsel %vm299_vm1, %v286_v21, %v294_v22  ;;  %v799_v21 = vld [vmem:[%s1838_s5 + $0x18] sm:$0xff] }
  0x8e   : > { %427 = vmatmul.mubr.f32.vlgmr.msra.gmra.mrb[0].mxu0 %v300_v24  ;;  %v1380_v22 = vpack.c.bf16 %v799_v21, %v798_v20  ;;  %v801_v24 = vld [vmem:[%s1838_s5 + $0x28] sm:$0xff] }
  0x8f   : > { %966 = vmatprep.mubr.msk.f32.mxu0 %vm299_vm1, %v292_v23  ;;  %1378 = vmatpush3.bf16.msra.mxu0 %v1377_v19  ;;  %v800_v23 = vld [vmem:[%s1838_s5 + $0x20] sm:$0xff] }
  0x90   : > { %v296_v25 = vpop.permute.xlu0 %295  ;;  %1379 = vmatprep.subr.bf16.mxu0 %v1500_v1 }
  0x91   : > { %v301_v26 = vsel %vm299_vm1, %v283_v11, %v296_v25  ;;  %v1151_v11 = vld [vmem:[%s1836_s3 + $0x98] sm:$0xff]   ;;  %v1383_v25 = vpack.c.bf16 %v801_v24, %v800_v23 }
  0x92   : > { %432 = vmatmul.mubr.f32.gmra.mrb[2].mxu0 %v301_v26  ;;  %v802_v26 = vld [vmem:[%s1838_s5 + $0x30] sm:$0xff] }
  0x93   : > { %1278 = vmatprep.mubr.msk.f32.mxu0 %vm1502_vm3, %v1503_v27  ;;  %1381 = vmatpush3.bf16.msra.mxu0 %v1380_v22 }
  0x94   : > { %1382 = vmatprep.subr.bf16.mxu0 %v1500_v1 }
  0x97   : > { %1384 = vmatpush3.bf16.msra.mxu0 %v1383_v25 }
  0x98   : > { %1385 = vmatprep.subr.bf16.mxu0 %v1500_v1 }
 0x161   : > { %v428_v29 = vpop.f32.mrb[0].mxu0 }
 0x162   : > { %v429_v30 = vadd.f32 %v964_v28, %v428_v29  ;;  %v430_v31 = vpop.f32.mrb[1].mxu0 }
 0x164   : > { %v437_v34 = vmax.f32 %v429_v30, 0.0 }
 0x165   : > { %v433_v33 = vpop.f32.mrb[2].mxu0 }
 0x166   : > { %v434_v35 = vadd.f32 %v964_v28, %v433_v33  ;;  %v435_v36 = vpop.f32.mrb[3].mxu0  ;;  %v441_v39 = vrot.slane %v437_v34, 1 }
 0x168   : > { %v438_v38 = vmax.f32 %v434_v35, 0.0 }
 0x16a   : > { %v442_v40 = vrot.slane %v438_v38, 1 }
 0x16c   : > { %v446_v43 = vsel %vm287_vm0, %v442_v40, 0.0  ;;  %v443_v44 = vsel %vm287_vm0, %v441_v39, %v442_v40 }
 0x16d   : > { %v448_v45 = vmax.f32 %v438_v38, %v446_v43  ;;  %v447_v46 = vmax.f32 %v437_v34, %v443_v44  ;;  %v804_v44 = vld [vmem:[%s1839_s6] sm:$0x1] }
 0x16f   : > { %v1318_v47 = vpack.c.bf16 %v448_v45, %v447_v46 }
 0x171   : > { %1319 = vmatpush3.bf16.msra.mxu1 %v1318_v47 }
 0x172   : > { %1321 = vmatprep.subr.bf16.mxu1 %v1140_v49 }
 0x174   : > { %1225 = vmatmul.mubr.msk.f32.vlgmr.msra.gmra.mrb[0].mxu1 %vm457_vm5, %v967_v48 }
 0x175   : > { %1323 = vmatpush3.bf16.msra.mxu1 %v1027_v50 }
 0x176   : > { %1325 = vmatprep.subr.bf16.mxu1 %v1141_v51 }
 0x179   : > { %1327 = vmatpush3.bf16.msra.mxu1 %v1133_v52 }
 0x17a   : > { %1329 = vmatprep.subr.bf16.mxu1 %v1142_v53 }
 0x17d   : > { %1331 = vmatpush3.bf16.msra.mxu1 %v1134_v54 }
 0x17e   : > { %1333 = vmatprep.subr.bf16.mxu1 %v1143_v55 }
 0x181   : > { %1335 = vmatpush3.bf16.msra.mxu1 %v1135_v56 }
 0x182   : > { %1337 = vmatprep.subr.bf16.mxu1 %v1144_v57 }
 0x185   : > { %1339 = vmatpush3.bf16.msra.mxu1 %v1136_v58 }
 0x186   : > { %1341 = vmatprep.subr.bf16.mxu1 %v1145_v59 }
 0x189   : > { %1343 = vmatpush3.bf16.msra.mxu1 %v1137_v60 }
 0x18a   : > { %1345 = vmatprep.subr.bf16.mxu1 %v1146_v61 }
 0x18d   : > { %1347 = vmatpush3.bf16.msra.mxu1 %v1138_v62 }
 0x18e   : > { %1349 = vmatprep.subr.bf16.mxu1 %v1147_v63 }
 0x191   : > { %1351 = vmatpush3.bf16.msra.mxu1 %v1139_v0 }
 0x192   : > { %1352 = vmatprep.subr.bf16.mxu1 %v1500_v1 }
 0x247   : > { %v527_v2 = vpop.f32.mrb[0].mxu1 }
 0x248   : > { %532 = vrot.lane.b32.xlu1 %v527_v2, %s1504_s21  ;;  %v1226_v3 = vpop.f32.mrb[1].mxu1 }
 0x2ba   : > { %v533_v4 = vpop.permute.xlu1 %532 }
 0x2bb   : > { %v536_v5 = vsel %vm535_vm6, %v533_v4, 0.0 }
 0x2bc   : > { %v537_v6 = vmax.f32 %v527_v2, %v536_v5 }
 0x2be   : > { %v539_v7 = vrot.slane %v537_v6, 7  ;;  %712 = vmatprep.mubr.f32.mxu1 %v537_v6  ;;  %v542_v16 = vrot.slane %v537_v6, 1 }
 0x2c0   : > { %971 = vmatmul.mubr.msk.f32.vlgmr.msra.gmra.mrb[2].mxu1 %vm970_vm7, %v539_v7 }
 0x2c1   : > { %1354 = vmatpush3.bf16.msra.mxu1 %v1148_v8  ;;  %1259 = vmatprep.mubr.msk.f32.mxu1 %vm1502_vm3, %v1503_v27  ;;  %v803_v27 = vld [vmem:[%s1838_s5 + $0x38] sm:$0xff] }
 0x2c2   : > { %1355 = vmatprep.subr.bf16.mxu1 %v1500_v1  ;;  %v1386_v28 = vpack.c.bf16 %v803_v27, %v802_v26 }
 0x2c4   : > { %1387 = vmatpush3.bf16.msra.mxu0 %v1386_v28 }
 0x2c5   : > { %1357 = vmatpush3.bf16.msra.mxu1 %v1149_v9 }
 0x2c6   : > { %1358 = vmatprep.subr.bf16.mxu1 %v1500_v1 }
 0x2c9   : > { %1360 = vmatpush3.bf16.msra.mxu1 %v1150_v10 }
 0x2ca   : > { %1361 = vmatprep.subr.bf16.mxu1 %v1500_v1 }
 0x2cd   : > { %1363 = vmatpush3.bf16.msra.mxu1 %v1151_v11 }
 0x2ce   : > { %1364 = vmatprep.subr.bf16.mxu1 %v1500_v1 }
 0x2d1   : > { %1366 = vmatpush3.bf16.msra.mxu1 %v1152_v12 }
 0x2d2   : > { %1367 = vmatprep.subr.bf16.mxu1 %v1500_v1 }
 0x2d5   : > { %1369 = vmatpush3.bf16.msra.mxu1 %v1153_v13 }
 0x2d6   : > { %1370 = vmatprep.subr.bf16.mxu1 %v1500_v1 }
 0x2d9   : > { %1372 = vmatpush3.bf16.msra.mxu1 %v1154_v14 }
 0x2da   : > { %1373 = vmatprep.subr.bf16.mxu1 %v1500_v1 }
 0x2dd   : > { %1375 = vmatpush3.bf16.msra.mxu1 %v1155_v15 }
 0x2e0   : > { %1260 = vmatmul.mubr.msk.f32.vlgmr.msra.gmra.mrb[4].mxu1 %vm287_vm0, %v542_v16 }
 0x393   : > { %v1191_v29 = vpop.f32.mrb[2].mxu1 }
 0x394   : > { %v1192_v30 = vpop.f32.mrb[3].mxu1 }
 0x395   : > { %v1193_v31 = vadd.f32 %v1192_v30, %v1191_v29 }
 0x397   : > { %v715_v33 = vadd.f32 %v1193_v31, %v969_v32 }
 0x3b3   : > { %v784_v34 = vpop.f32.mrb[4].mxu1 }
 0x3b4   : > { %v785_v1 = vadd.f32 %v784_v34, %v715_v33  ;;  %v1261_v35 = vpop.f32.mrb[5].mxu1 }
 0x3b6   : > { %v788_v36 = vmax.f32 %v785_v1, 0.0 }
 0x3b8   : > { %v789_v37 = vsel %vm299_vm1, %v788_v36, 0.0 }
 0x3b9   : > { %v790_v38 = vrot.slane %v789_v37, 4 }
 0x3bb   : > { %v791_v39 = vadd.f32 %v790_v38, %v789_v37 }
 0x3bd   : > { %v792_v40 = vrot.slane %v791_v39, 2 }
 0x3bf   : > { %v793_v41 = vadd.f32 %v792_v40, %v791_v39 }
 0x3c1   : > { %v794_v42 = vrot.slane %v793_v41, 1 }
 0x3c3   : > { %v795_v43 = vadd.f32 %v794_v42, %v793_v41 }
 0x3c5   : > { %1279 = vmatmul.mubr.msk.f32.vlgmr.msra.gmra.mrb[4].mxu0 %vm299_vm1, %v795_v43 }
 0x498   : > { %v874_v45 = vpop.f32.mrb[4].mxu0 }
 0x499   : > { %v875_v46 = vadd.f32 %v874_v45, %v804_v44  ;;  %v1280_v47 = vpop.f32.mrb[5].mxu0 }
 0x49b   : > { %v878_v48 = vand.u32 2147483647, %v875_v46  ;;  %vm882_vm9 = vcmp.ge.f32.partialorder %v875_v46, 0.0 }
 0x49d   : > { %v879_v49 = vsub.f32 0.0, %v878_v48 }
 0x49f   : > { %v880_v50 = vmul.f32 1.442695, %v879_v49 }
 0x4a1   : > { %1432 = vpow2.f32 %v880_v50 }
 0x4ab   : > { %v1433_v51 = vpop.eup %1432 }
 0x4ac   : > { %v883_v52 = vadd.f32 1.0, %v1433_v51 }
 0x4ae   : > { %1434 = vrcp.f32 %v883_v52 }
 0x4b8   : > { %v1435_v53 = vpop.eup %1434 }
 0x4b9   : > { %v886_v54 = vmul.f32 %v1435_v53, %v1433_v51 }
 0x4bb   : > { %v887_v55 = vsel %vm882_vm9, %v1435_v53, %v886_v54 }
 0x4bc   : > { %889 = vst.msk [vmem:[%s270_s18] sm:$0x1] %vm888_vm8, %v887_v55 }
 0x4bd   : > { %1449 = shalt.err (!%p1446_p3)
}
 0x4be   : > { %s1450_s13 = scalar_lea.hbm %s1791_s22, 16  ;;  %s1454_s16 = scalar_lea.hbm %s1840_s7, 32 }
 0x4bf   : > { %p1451_p4 = scmp.ne.s32.totalorder %s1791_s22, %s1450_s13  ;;  %p1455_p9 = scmp.lt.u32.totalorder %s1791_s22, %s1840_s7 }
 0x4c0   : > { %p1456_p10 = scmp.lt.u32.totalorder %s1454_s16, %s1450_s13  ;;  %p1458_p12 = scmp.lt.u32.totalorder %s1450_s13, %s1791_s22 }
 0x4c1   : > { %p1452_p7 = pnand %p1451_p4, %p1584_p5 }
 0x4c2   : > { %p1457_p11 = por %p1456_p10, %p1455_p9 }
 0x4c3   : > { %p1453_p8 = pneg %p1452_p7 }
 0x4c4   : > { %p1459_p13 = por %p1458_p12, %p1457_p11 }
 0x4c6   : > { %p1460_p0 = pnand %p1459_p13, %p1453_p8 }
 0x4c8   : > { %1463 = shalt.err (!%p1460_p0)
}
 0x4c9   : > { %1388 = dma.vmem_to_hbm [thread:$0]  (%p1584_p5), %s1793_s19, 16, %s1791_s22, %s891_s23  }
 0x4ca PF: > { %p1394_p1 = scmp.ge.s32.totalorder %s1498_s27, 2  ;;  %s915_s20 = sand.u32 1, %s1486_s24  }
 0x4cb   : > { %s916_s21 = scalar_lea.sflag [#allocation3], %s915_s20 }
 0x4cc   : > { %p1391_p2 = pnand %p1394_p1, %p1588_p6 }
 0x4ce   : > { %1481 = dma.done.wait (!%p1391_p2), %s916_s21, 16  }
 0x4cf   : > { %1483 = vsyncadd (!%p1391_p2), %s916_s21, 4294967280  ;;  %p17_p3 = scmp.ge.s32.totalorder %s1571_s30, 4   ;;  %s1843_s24 = smov %s1490_s25 }
 0x4d0   : > { %s1844_s25 = smov %s1494_s26  ;;  %s1845_s26 = smov %s1582_s10 }
 0x4d1   : > { %s1846_s27 = smov %s1571_s30  ;;  %19 = sbr.rel (!%p17_p3) target bundleno = 3 (0x3), region = 83 }
 0x4d8   :  { %920 = vsyncpa [#allocation3], 1 }
 0x4d9   :  { %922 = vsyncpa [#allocation3 + $0x1], 1 }

</bundles_post_ra>
